<compile_context>
chip_gen: v7x
topology: tpu7x:2x2x1
jax: 0.10.0
libtpu: 0.0.40
codegen_flags: <defaults>
</compile_context>

<pallas_src>
import functools

import jax
import jax.numpy as jnp
from jax import lax
from jax.experimental import pallas as pl
from jax.experimental.pallas import tpu as pltpu

_DESIRED_TILE = 256   # rows of flattened (B*T) per grid step (sweet spot 256-512)
_SUBLANE = 8


def _round_up(x, m):
    return ((x + m - 1) // m) * m


def _pick_tile(bt):
    """Sublane-aligned row tile: big enough to amortize ~0.35us/step fixed
    overhead, small enough to keep >= 2 grid steps for v7x's 2 TensorCores."""
    bt8 = _round_up(max(bt, 1), _SUBLANE)
    if bt8 <= _SUBLANE:
        return _SUBLANE
    return min(_DESIRED_TILE, _round_up((bt8 + 1) // 2, _SUBLANE))


def _make_kernel(tile, vocab, bt_real, has_targets):
    """Per-tile kernel: VMEM-resident table, one-hot MXU gather, fused CE."""

    def kernel(*refs):
        if has_targets:
            idx_ref, tgt_ref, table_ref, logits_ref, rowloss_ref = refs
        else:
            idx_ref, table_ref, logits_ref = refs

        # Embedding row-gather as a one-hot matmul on the (otherwise idle)
        # MXU.  The table lives in VMEM (constant index_map), so there are no
        # per-row DMAs, no semaphores, and no scratch->output copy.
        col = lax.broadcasted_iota(jnp.int32, (tile, vocab), 1)
        onehot = (col == idx_ref[...]).astype(jnp.float32)            # (tile, V)
        logits = jnp.dot(onehot, table_ref[...],
                         preferred_element_type=jnp.float32)          # (tile, V)
        logits_ref[...] = logits            # direct store to pipelined output

        if has_targets:
            # Fused per-row cross-entropy; vocab axis is unpadded so no
            # column masking is needed.
            m = jnp.max(logits, axis=-1, keepdims=True)               # (tile, 1)
            lse = m + jnp.log(jnp.sum(jnp.exp(logits - m),
                                      axis=-1, keepdims=True))        # (tile, 1)
            picked = jnp.sum(jnp.where(col == tgt_ref[...], logits, 0.0),
                             axis=-1, keepdims=True)                  # (tile, 1)
            # Zero out padded rows (>= bt_real) so the wrapper can reduce the
            # whole rowloss array without slicing.
            row = (pl.program_id(0) * tile
                   + lax.broadcasted_iota(jnp.int32, (tile, 1), 0))
            rowloss_ref[...] = jnp.where(row < bt_real, lse - picked, 0.0)

    return kernel


@functools.partial(jax.jit, static_argnames=("tile", "bt_real"))
def _bigram_loss_fwd(idx2d, tgt2d, table, *, tile, bt_real):
    btp = idx2d.shape[0]
    vocab = table.shape[1]
    kernel = _make_kernel(tile, vocab, bt_real, True)
    bytes_accessed = (idx2d.size + tgt2d.size) * 4 + table.size * 4 \
        + btp * vocab * 4 + btp * 4
    logits, rowloss = pl.pallas_call(
        kernel,
        out_shape=(
            jax.ShapeDtypeStruct((btp, vocab), jnp.float32),
            jax.ShapeDtypeStruct((btp, 1), jnp.float32),
        ),
        grid_spec=pltpu.PrefetchScalarGridSpec(
            num_scalar_prefetch=0,
            grid=(btp // tile,),
            in_specs=[
                pl.BlockSpec((tile, 1), lambda i: (i, 0)),        # idx
                pl.BlockSpec((tile, 1), lambda i: (i, 0)),        # targets
                pl.BlockSpec((vocab, vocab), lambda i: (0, 0)),   # table (VMEM-resident)
            ],
            out_specs=(
                pl.BlockSpec((tile, vocab), lambda i: (i, 0)),    # logits
                pl.BlockSpec((tile, 1), lambda i: (i, 0)),        # per-row loss
            ),
        ),
        compiler_params=pltpu.CompilerParams(
            dimension_semantics=("parallel",),
            vmem_limit_bytes=32 * 1024 * 1024),
        cost_estimate=pl.CostEstimate(
            flops=2 * btp * vocab * vocab + 8 * btp * vocab,
            transcendentals=btp * vocab,
            bytes_accessed=bytes_accessed),
    )(idx2d, tgt2d, table)
    loss = jnp.sum(rowloss) / bt_real     # padded rows are already zeroed
    return logits, loss


@functools.partial(jax.jit, static_argnames=("tile",))
def _bigram_logits_fwd(idx2d, table, *, tile):
    btp = idx2d.shape[0]
    vocab = table.shape[1]
    kernel = _make_kernel(tile, vocab, 0, False)
    bytes_accessed = idx2d.size * 4 + table.size * 4 + btp * vocab * 4
    logits = pl.pallas_call(
        kernel,
        out_shape=jax.ShapeDtypeStruct((btp, vocab), jnp.float32),
        grid_spec=pltpu.PrefetchScalarGridSpec(
            num_scalar_prefetch=0,
            grid=(btp // tile,),
            in_specs=[
                pl.BlockSpec((tile, 1), lambda i: (i, 0)),        # idx
                pl.BlockSpec((vocab, vocab), lambda i: (0, 0)),   # table (VMEM-resident)
            ],
            out_specs=pl.BlockSpec((tile, vocab), lambda i: (i, 0)),
        ),
        compiler_params=pltpu.CompilerParams(
            dimension_semantics=("parallel",),
            vmem_limit_bytes=32 * 1024 * 1024),
        cost_estimate=pl.CostEstimate(
            flops=2 * btp * vocab * vocab,
            transcendentals=0,
            bytes_accessed=bytes_accessed),
    )(idx2d, table)
    return logits


class BigramLanguageModelPallas:
    """JAX/Pallas port of the PyTorch BigramLanguageModel forward pass."""

    def __init__(self, vocab_size, key):
        self.vocab_size = vocab_size
        self.n_embed = vocab_size
        # nn.Embedding default init: N(0, 1)
        self.token_embedding_table = jax.random.normal(
            key, (vocab_size, vocab_size), dtype=jnp.float32)
        # TODO(synk): for vocabularies whose (V, V) table does not fit VMEM,
        # fall back to an HBM-resident table with a double-buffered DMA gather.

    def forward(self, idx, targets=None):
        B, T = idx.shape
        V = self.vocab_size
        bt = B * T
        tile = _pick_tile(bt)
        btp = _round_up(bt, tile)

        idx_flat = idx.reshape(bt).astype(jnp.int32)
        if btp > bt:
            idx_flat = jnp.pad(idx_flat, (0, btp - bt))
        idx2d = idx_flat.reshape(btp, 1)

        if targets is None:
            logits = _bigram_logits_fwd(idx2d, self.token_embedding_table,
                                        tile=tile)
            if btp > bt:
                logits = logits[:bt]
            return logits.reshape(B, T, V), None

        tgt_flat = targets.reshape(bt).astype(jnp.int32)
        if btp > bt:
            tgt_flat = jnp.pad(tgt_flat, (0, btp - bt))
        tgt2d = tgt_flat.reshape(btp, 1)

        logits, loss = _bigram_loss_fwd(idx2d, tgt2d,
                                        self.token_embedding_table,
                                        tile=tile, bt_real=bt)
        if btp > bt:
            logits = logits[:bt]
        return logits, loss          # PyTorch returns (B*T, V) logits here

    # TODO(synk): generate() uses torch.multinomial autoregressive sampling;
    # that loop is host/JAX-level glue, not a hot-path kernel op.


def _reference(table, idx, targets):
    logits = table[idx]                          # (B, T, V)
    B, T, V = logits.shape
    lf = logits.reshape(B * T, V)
    tf = targets.reshape(B * T)
    lse = jax.nn.logsumexp(lf, axis=-1)
    picked = jnp.take_along_axis(lf, tf[:, None], axis=-1)[:, 0]
    return lf, jnp.mean(lse - picked)


if __name__ == "__main__":
    vocab_size = 64
    B, T = 2, 8

    key = jax.random.PRNGKey(0)
    k_emb, k_idx, k_tgt = jax.random.split(key, 3)

    model = BigramLanguageModelPallas(vocab_size, k_emb)

    idx = jax.random.randint(k_idx, (B, T), 0, vocab_size, dtype=jnp.int32)
    targets = jax.random.randint(k_tgt, (B, T), 0, vocab_size, dtype=jnp.int32)

    logits, loss = model.forward(idx, targets)
    logits = jax.block_until_ready(logits)
    loss = jax.block_until_ready(loss)

    ref_logits, ref_loss = _reference(model.token_embedding_table, idx, targets)
    assert logits.shape == (B * T, vocab_size)
    assert jnp.allclose(logits, ref_logits, atol=1e-5, rtol=1e-5)
    assert jnp.allclose(loss, ref_loss, atol=1e-4, rtol=1e-4)

    # targets=None path (logits-only kernel variant)
    logits_only, none_loss = model.forward(idx, None)
    logits_only = jax.block_until_ready(logits_only)
    assert logits_only.shape == (B, T, vocab_size) and none_loss is None
    assert jnp.allclose(logits_only.reshape(B * T, vocab_size), ref_logits,
                        atol=1e-5, rtol=1e-5)

    print("KERNEL_OK")
</pallas_src>

<mosaic_0001>
module attributes {stable_mosaic.version = 11 : i64} {
  func.func @kernel(%arg0: i32, %arg1: memref<8x1xi32, #tpu.memory_space<vmem>>, %arg2: memref<8x1xi32, #tpu.memory_space<vmem>>, %arg3: memref<64x64xf32, #tpu.memory_space<vmem>>, %arg4: memref<8x64xf32, #tpu.memory_space<vmem>>, %arg5: memref<8x1xf32, #tpu.memory_space<vmem>>) attributes {dimension_semantics = [#tpu.dimension_semantics<parallel>], iteration_bounds = array<i64: 2>, scalar_prefetch = 0 : i64, scratch_operands = 0 : i64, tpu.core_type = #tpu.core_type<tc>, window_params = [{transform_indices = @transform_0, window_bounds = array<i64: 8, 1>}, {transform_indices = @transform_1, window_bounds = array<i64: 8, 1>}, {pipeline_mode = #tpu.pipeline_mode<synchronous>, transform_indices = @transform_2, window_bounds = array<i64: 64, 64>}, {transform_indices = @transform_3, window_bounds = array<i64: 8, 64>}, {transform_indices = @transform_4, window_bounds = array<i64: 8, 1>}]} {
    %0 = tpu.iota {dimensions = array<i32: 1>} : vector<8x64xi32>
    %c0 = arith.constant 0 : index
    %c0_0 = arith.constant 0 : index
    %1 = vector.load %arg1[%c0, %c0_0] : memref<8x1xi32, #tpu.memory_space<vmem>>, vector<8x1xi32>
    %2 = vector.broadcast %1 : vector<8x1xi32> to vector<8x64xi32>
    %3 = arith.cmpi eq, %0, %2 : vector<8x64xi32>
    %4 = arith.extui %3 : vector<8x64xi1> to vector<8x64xi32>
    %5 = arith.sitofp %4 : vector<8x64xi32> to vector<8x64xf32>
    %c0_1 = arith.constant 0 : index
    %c0_2 = arith.constant 0 : index
    %6 = vector.load %arg3[%c0_1, %c0_2] : memref<64x64xf32, #tpu.memory_space<vmem>>, vector<64x64xf32>
    %cst = arith.constant dense<0.000000e+00> : vector<8x64xf32>
    %7 = tpu.matmul %5, %6, %cst {dimension_numbers = #tpu.dot_dimension_numbers<[1], [0], [0], [1], [0, 0, 1, 1], [], []>} : vector<8x64xf32>, vector<64x64xf32>, vector<8x64xf32> -> vector<8x64xf32>
    %c0_3 = arith.constant 0 : index
    %c0_4 = arith.constant 0 : index
    %8 = vector.load %arg4[%c0_3, %c0_4] : memref<8x64xf32, #tpu.memory_space<vmem>>, vector<8x64xf32>
    tpu.vector_store %arg4[%c0_3, %c0_4], %7 {strides = array<i32>} : memref<8x64xf32, #tpu.memory_space<vmem>>, vector<8x64xf32>,
    %cst_5 = arith.constant dense<0xFF800000> : vector<8xf32>
    %9 = vector.multi_reduction <maximumf>, %7, %cst_5 [1] : vector<8x64xf32> to vector<8xf32>
    %10 = vector.shape_cast %9 : vector<8xf32> to vector<8x1xf32>
    %11 = vector.broadcast %10 : vector<8x1xf32> to vector<8x64xf32>
    %12 = arith.subf %7, %11 : vector<8x64xf32>
    %13 = math.exp %12 : vector<8x64xf32>
    %cst_6 = arith.constant dense<0.000000e+00> : vector<8xf32>
    %14 = vector.multi_reduction <add>, %13, %cst_6 [1] : vector<8x64xf32> to vector<8xf32>
    %15 = vector.shape_cast %14 : vector<8xf32> to vector<8x1xf32>
    %16 = math.log %15 : vector<8x1xf32>
    %17 = arith.addf %10, %16 : vector<8x1xf32>
    %c0_7 = arith.constant 0 : index
    %c0_8 = arith.constant 0 : index
    %18 = vector.load %arg2[%c0_7, %c0_8] : memref<8x1xi32, #tpu.memory_space<vmem>>, vector<8x1xi32>
    %19 = vector.broadcast %18 : vector<8x1xi32> to vector<8x64xi32>
    %20 = arith.cmpi eq, %0, %19 : vector<8x64xi32>
    %cst_9 = arith.constant 0.000000e+00 : f32
    %21 = vector.broadcast %cst_9 : f32 to vector<8x64xf32>
    %22 = arith.select %20, %7, %21 : vector<8x64xi1>, vector<8x64xf32>
    %cst_10 = arith.constant dense<0.000000e+00> : vector<8xf32>
    %23 = vector.multi_reduction <add>, %22, %cst_10 [1] : vector<8x64xf32> to vector<8xf32>
    %24 = vector.shape_cast %23 : vector<8xf32> to vector<8x1xf32>
    %c8_i32 = arith.constant 8 : i32
    %25 = arith.muli %arg0, %c8_i32 : i32
    %26 = tpu.iota {dimensions = array<i32: 0>} : vector<8x1xi32>
    %27 = vector.broadcast %25 : i32 to vector<8x1xi32>
    %28 = arith.addi %27, %26 : vector<8x1xi32>
    %c16_i32 = arith.constant 16 : i32
    %29 = vector.broadcast %c16_i32 : i32 to vector<8x1xi32>
    %30 = arith.cmpi slt, %28, %29 : vector<8x1xi32>
    %31 = arith.subf %17, %24 : vector<8x1xf32>
    %cst_11 = arith.constant 0.000000e+00 : f32
    %32 = vector.broadcast %cst_11 : f32 to vector<8x1xf32>
    %33 = arith.select %30, %31, %32 : vector<8x1xi1>, vector<8x1xf32>
    %c0_12 = arith.constant 0 : index
    %c0_13 = arith.constant 0 : index
    %34 = vector.load %arg5[%c0_12, %c0_13] : memref<8x1xf32, #tpu.memory_space<vmem>>, vector<8x1xf32>
    tpu.vector_store %arg5[%c0_12, %c0_13], %33 {strides = array<i32>} : memref<8x1xf32, #tpu.memory_space<vmem>>, vector<8x1xf32>,
    return
  }
  func.func @transform_0(%arg0: i32) -> (i32, i32) {
    %c0_i32 = arith.constant 0 : i32
    %c0_i32_0 = arith.constant 0 : i32
    return %arg0, %c0_i32 : i32, i32
  }
  func.func @transform_1(%arg0: i32) -> (i32, i32) {
    %c0_i32 = arith.constant 0 : i32
    %c0_i32_0 = arith.constant 0 : i32
    return %arg0, %c0_i32 : i32, i32
  }
  func.func @transform_2(%arg0: i32) -> (i32, i32) {
    %c0_i32 = arith.constant 0 : i32
    %c0_i32_0 = arith.constant 0 : i32
    %c0_i32_1 = arith.constant 0 : i32
    return %c0_i32, %c0_i32_0 : i32, i32
  }
  func.func @transform_3(%arg0: i32) -> (i32, i32) {
    %c0_i32 = arith.constant 0 : i32
    %c0_i32_0 = arith.constant 0 : i32
    return %arg0, %c0_i32 : i32, i32
  }
  func.func @transform_4(%arg0: i32) -> (i32, i32) {
    %c0_i32 = arith.constant 0 : i32
    %c0_i32_0 = arith.constant 0 : i32
    return %arg0, %c0_i32 : i32, i32
  }
}

</mosaic_0001>

<bundles_post_ra>
// kernel: _bigram_loss_fwd.1
= control target key start
LH: loop header
LB: loop body
LE: loop exit
PB: predicated region body
PF: predicated region fallthrough
CT: control target
= control target key end

     0   :  { %10 = vsyncpa [#allocation3], 0  ;;  %s881_s0 = inlined_call_operand.vmem [shape: s32[16,1], index: 0, kind: input, shape index: {}]   ;;  %s882_s1 = inlined_call_operand.vmem [shape: s32[16,1], index: 1, kind: input, shape index: {}]   ;;  %s883_s2 = inlined_call_operand.hbm [shape: f32[64,64], index: 2, kind: input, shape index: {}]   ;;  %s884_s3 = inlined_call_operand.hbm [shape: f32[16,64], index: 3, kind: output, shape index: {0}]   ;;  %s885_s4 = inlined_call_operand.vmem [shape: f32[16,1], index: 4, kind: output, shape index: {1}]  }
   0x1   :  { %11 = vsyncpa [#allocation4], 0 }
   0x2   :  { %13 = vsyncpa [#allocation4 + $0x1], 0  ;;  %s735_s15 = smov 0   ;;  %s737_s16 = smov 0  }
   0x3   :  { %s739_s17 = smov 0   ;;  %s741_s18 = smov 0  }
   0x4 LB: > { %s756_s19 = sadd.s32 4294967295, %s700_s18   ;;  %s487_s20 = sadd.s32 4294967294, %s700_s18   ;;  %s700_s18 = sphi %s741_s18, %s901_s18   ;;  %s696_s17 = sphi %s739_s17, %s900_s17   ;;  %s692_s16 = sphi %s737_s16, %s899_s16   ;;  %s688_s15 = sphi %s735_s15, %s898_s15  }
   0x5   : > { %s760_s21 = sadd.s32 1, %s700_s18   ;;  %s99_s22 = sadd.s32 1, %s696_s17 }
   0x6   : > { %s96_s23 = ssub.s32 %s700_s18, %s760_s21  ;;  %p109_p0 = scmp.ne.s32.totalorder %s696_s17, %s692_s16 }
   0x7   : > { %p97_p1 = scmp.eq.s32.totalorder %s96_s23, 0  ;;  %p110_p2 = scmp.eq.s32.totalorder %s756_s19, 1 }
   0x8   : > { %p115_p3 = scmp.ne.s32.totalorder %s692_s16, %s688_s15  ;;  %p116_p4 = scmp.eq.s32.totalorder %s487_s20, 1 }
   0x9   : > { %s771_s24 = scalar_select %p97_p1, %s696_s17, %s99_s22  }
   0xa   : > { %p773_p5 = por %p110_p2, %p109_p0  ;;  %p777_p6 = por %p116_p4, %p115_p3 }
   0xb   : > { %p488_p7 = scmp.ge.s32.totalorder %s700_s18, 1  ;;  %p149_p8 = scmp.lt.s32.totalorder %s700_s18, 3 }
   0xc   : > { %s889_s25 = scalar_select %p773_p5, 1, 0 }
   0xd   : > { %s890_s26 = scalar_select %p777_p6, 1, 0 }
   0xe   : > { %p886_p9 = scmp.eq.s32.totalorder %s756_s19, 0  ;;  %p784_p10 = pnand %p488_p7, %p149_p8 }
   0xf   : > { %s702_s28 = smov [#allocation2]   ;;  %s606_s7 = scalar_lea.hbm %s883_s2, 1024 }
  0x10   : > { %s891_s27 = scalar_select %p784_p10, 1, 0 }
  0x11   : > { %s161_s29 = sshll.u32 %s702_s28, 4  ;;  %p550_p11 = pneg %p784_p10  ;;  %s162_s29 = int_to_ptr.vmem [resolvable:$true] %s161_s29 }
  0x12   : > { %p607_p13 = scmp.ne.s32.totalorder %s883_s2, %s606_s7  ;;  %p613_p3 = scmp.lt.u32.totalorder %s606_s7, %s883_s2 }
  0x13   : > { %p792_p12 = pnand %p886_p9, %p550_p11 }
  0x15   : > { %p608_p0 = pneg %p792_p12 }
  0x17   : > { %p609_p1 = pnand %p608_p0, %p607_p13 }
  0x19   : > { %p610_p2 = pneg %p609_p1 }
  0x1b   : > { %p615_p4 = pnand %p613_p3, %p610_p2 }
  0x1d   : > { %618 = shalt.err (!%p615_p4)
}
  0x1e   : > { %s619_s12 = scalar_lea.vmem %s162_s29, 1024  ;;  %p627_p9 = scmp.lt.s32.totalorder %s162_s29, %s162_s29 }
  0x1f   : > { %p620_p7 = scmp.ne.s32.totalorder %s162_s29, %s619_s12  ;;  %p628_p6 = scmp.lt.s32.totalorder %s619_s12, %s619_s12 }
  0x21   : > { %p622_p8 = pnand %p620_p7, %p608_p0  ;;  %p629_p5 = por %p628_p6, %p627_p9 }
  0x23   : > { %p623_p11 = pneg %p622_p8 }
  0x25   : > { %p630_p10 = pnand %p629_p5, %p623_p11 }
  0x27   : > { %633 = shalt.err (!%p630_p10)
}
  0x28   : > { %s703_s13 = smov 128   ;;  %s704_s14 = smov 8  }
  0x29   : > { %553 = dma.hbm_to_vmem [thread:$0]  (!%p792_p12), %s883_s2, 1024, %s162_s29, [#allocation3], %s703_s13, %s703_s13, %s704_s14  }
  0x2a   : > { %p893_p13 = scmp.ne.s32.totalorder %s891_s27, 0 }
  0x2b   : > { %p894_p1 = scmp.eq.s32.totalorder (!%p893_p13), %s756_s19, 0 }
  0x2c   : > { %191 = sbr.rel (%p893_p13) target bundleno = 721 (0x2d1), region = 32 }
  0x33   : > { %679 = dma.done.wait (%p894_p1), [#allocation3], 1024   ;;  %p895_p0 = pmov %p894_p1 }
  0x34   : > { %p224_p5 = scmp.lt.s32.totalorder %s756_s19, 1  ;;  %v705_v0 = vmov 0   ;;  %v706_v1 = vmov 0.0|0.0   ;;  %v245_v3 = vld [vmem:[#allocation2] sm:$0xff]  ;;  %v246_v4 = vld [vmem:[#allocation2 + $0x8] sm:$0xff]  ;;  %v247_v6 = vld [vmem:[#allocation2 + $0x10] sm:$0xff]  ;;  %v236_v17 = vlaneseq }
  0x35   : > { %681 = vsyncadd (%p895_p0), [#allocation3], 4294966272  ;;  %600 = vset.pattern.permute.xlu0 %v705_v0  ;;  %532 = vmatprep.subr.bf16.mxu0 %v706_v1  ;;  %v533_v5 = vpack.c.bf16 %v246_v4, %v245_v3  ;;  %v248_v7 = vld [vmem:[#allocation2 + $0x18] sm:$0xff]  ;;  %vm707_vm0 = vmmov 0   ;;  %v708_v8 = vmov 0.0   ;;  %v249_v10 = vld [vmem:[#allocation2 + $0x20] sm:$0xff] }
  0x36   : > { %s225_s23 = scalar_select %p224_p5, %s756_s19, 1  ;;  %601 = vset.pattern.permute.xlu1 %v705_v0  ;;  %529 = vmatprep.mubr.msk.f32.mxu0 %vm707_vm0, %v708_v8  ;;  %v536_v9 = vpack.c.bf16 %v248_v7, %v247_v6  ;;  %v250_v11 = vld [vmem:[#allocation2 + $0x28] sm:$0xff]  ;;  %v251_v14 = vld [vmem:[#allocation2 + $0x30] sm:$0xff]  ;;  %v252_v15 = vld [vmem:[#allocation2 + $0x38] sm:$0xff]  ;;  %v237_v18 = vand.u32 127, %v236_v17  ;;  %vm253_vm1 = vcmask 523264  }
  0x37   : > { %534 = vmatpush3.bf16.msra.mxu0 %v533_v5  ;;  %v539_v13 = vpack.c.bf16 %v250_v11, %v249_v10  ;;  %v542_v16 = vpack.c.bf16 %v252_v15, %v251_v14  ;;  %s215_s8 = sand.u32 1, %s692_s16   ;;  %s501_s11 = sshll.u32 %s756_s19, 7 }
  0x38   : > { %s820_s28 = sshll.u32 %s225_s23, 3  ;;  %535 = vmatprep.subr.bf16.mxu0 %v706_v1  ;;  %s493_s9 = sshll.u32 %s215_s8, 3 }
  0x39   : > { %s227_s30 = scalar_lea.vmem %s881_s0, %s820_s28  ;;  %s231_s7 = scalar_lea.vmem %s882_s1, %s820_s28 }
  0x3a   : > { %v238_v2 = vld [vmem:[%s227_s30] sm:$0xff]  ;;  %s217_s10 = scalar_lea.vmem [#allocation5], %s493_s9  ;;  %s840_s20 = scalar_lea.hbm %s884_s3, %s501_s11 }
  0x3b   : > { %240 = vperm.xlu0 %600, %v238_v2   ;;  %v340_v12 = vld [vmem:[%s231_s7] sm:$0xff]  ;;  %537 = vmatpush3.bf16.msra.mxu0 %v536_v9  ;;  %s377_s12 = sshll.u32 %s217_s10, 4  ;;  %s360_s22 = scalar_lea.sflag [#allocation4], %s215_s8  ;;  %s378_s12 = int_to_ptr.vmem [resolvable:$true] %s377_s12 }
  0x3c   : > { %342 = vperm.xlu1 %601, %v340_v12   ;;  %538 = vmatprep.subr.bf16.mxu0 %v706_v1  ;;  %s634_s23 = scalar_lea.vmem %s378_s12, 128  ;;  %p896_p9 = scmp.ne.s32.totalorder %s889_s25, 0 }
  0x3d   : > { %p635_p6 = scmp.ne.s32.totalorder %s378_s12, %s634_s23  ;;  %s709_s27 = smov [#allocation5]  }
  0x3e   : > { %s638_s29 = sshll.u32 %s709_s27, 4  ;;  %s639_s29 = int_to_ptr.vmem [resolvable:$false] %s638_s29 }
  0x3f   : > { %540 = vmatpush3.bf16.msra.mxu0 %v539_v13  ;;  %p636_p10 = pnand %p635_p6, %p896_p9  ;;  %s640_s30 = scalar_lea.vmem %s639_s29, 256 }
  0x40   : > { %541 = vmatprep.subr.bf16.mxu0 %v706_v1  ;;  %p641_p2 = scmp.lt.s32.totalorder %s378_s12, %s639_s29  ;;  %p642_p3 = scmp.lt.s32.totalorder %s640_s30, %s634_s23 }
  0x41   : > { %p637_p12 = pneg %p636_p10 }
  0x42   : > { %p643_p4 = por %p642_p3, %p641_p2 }
  0x43   : > { %543 = vmatpush3.bf16.msra.mxu0 %v542_v16 }
  0x44   : > { %p644_p7 = pnand %p643_p4, %p637_p12 }
  0xba   : > { %v241_v19 = vpop.permute.xlu0 %240 }
  0xbb   : > { %vm242_vm2 = vcmp.eq.s32.totalorder %v237_v18, %v241_v19  ;;  %v343_v21 = vpop.permute.xlu1 %342 }
  0xbc   : > { %v497_v20 = vsel %vm242_vm2, 1.0, %v708_v8  ;;  %vm344_vm3 = vcmp.eq.s32.totalorder %v237_v18, %v343_v21 }
  0xbd   : > { %530 = vmatmul.mubr.msk.f32.vlgmr.msra.gmra.mrb[0].mxu0 %vm253_vm1, %v497_v20 }
 0x190   : > { %v323_v22 = vpop.f32.mrb[0].mxu0 }
 0x191   : > { %v531_v23 = vpop.f32.mrb[1].mxu0  ;;  %v328_v24 = vsel %vm253_vm1, %v323_v22, -inf  ;;  %v345_v25 = vsel %vm344_vm3, %v323_v22, 0.0  ;;  %327 = vst.msk [vmem:[%s217_s10] sm:$0xff] %vm253_vm1, %v323_v22 }
 0x192   : > { %329 = vmax.xlane.f32.xlu0 %v328_v24  ;;  %v346_v26 = vsel %vm253_vm1, %v345_v25, 0.0 }
 0x196   : > { %347 = vadd.xlane.f32.xlu0 %v346_v26 }
 0x21f   : > { %v330_v27 = vpop.xlane.xlu0 %329 }
 0x220   : > { %v331_v28 = vsub.f32 %v323_v22, %v330_v27 }
 0x222   : > { %v332_v29 = vmul.f32 1.442695, %v331_v28 }
 0x224   : > { %602 = vpow2.f32 %v332_v29 }
 0x22e   : > { %v603_v30 = vpop.eup %602 }
 0x22f   : > { %v334_v31 = vsel %vm253_vm1, %v603_v30, 0.0 }
 0x230   : > { %335 = vadd.xlane.f32.xlu1 %v334_v31 }
 0x231   : > { %647 = shalt.err (!%p644_p7)
}
 0x232   : > { %s648_s5 = scalar_lea.hbm %s840_s20, 128  ;;  %s652_s8 = scalar_lea.hbm %s884_s3, 256 }
 0x233   : > { %p649_p8 = scmp.ne.s32.totalorder %s840_s20, %s648_s5  ;;  %p653_p1 = scmp.lt.u32.totalorder %s840_s20, %s884_s3 }
 0x234   : > { %p654_p0 = scmp.lt.u32.totalorder %s652_s8, %s648_s5  ;;  %p656_p6 = scmp.lt.u32.totalorder %s648_s5, %s840_s20 }
 0x235   : > { %p650_p11 = pnand %p649_p8, %p896_p9 }
 0x236   : > { %p655_p5 = por %p654_p0, %p653_p1 }
 0x237   : > { %p651_p13 = pneg %p650_p11 }
 0x238   : > { %p657_p10 = por %p656_p6, %p655_p5 }
 0x23a   : > { %p658_p12 = pnand %p657_p10, %p651_p13 }
 0x23c   : > { %661 = shalt.err (!%p658_p12)
}
 0x23d   : > { %548 = dma.vmem_to_hbm [thread:$0]  (%p896_p9), %s378_s12, 128, %s840_s20, %s360_s22   ;;  %v351_v33 = vshrl.u32 %v236_v17, 7  ;;  %v348_v39 = vpop.xlane.xlu0 %347  ;;  %vm357_vm5 = vcmask 7168  }
 0x23e   : > { %s499_s11 = sshll.u32 %s756_s19, 3  ;;  %s235_s23 = scalar_lea.vmem %s885_s4, %s820_s28 }
 0x23f   : > { %v352_v34 = vstv %s499_s11 }
 0x240   : > { %v353_v36 = vadd.s32 %v352_v34, %v351_v33 }
 0x242   : > { %vm354_vm4 = vcmp.lt.s32.totalorder %v353_v36, 16 }
 0x2bd   : > { %v336_v32 = vpop.xlane.xlu1 %335 }
 0x2be   : > { %604 = vlog2.f32 %v336_v32 }
 0x2c8   : > { %v605_v35 = vpop.eup %604 }
 0x2c9   : > { %v338_v37 = vmul.f32 0.6931472, %v605_v35 }
 0x2cb   : > { %v339_v38 = vadd.f32 %v338_v37, %v330_v27 }
 0x2cd   : > { %v355_v40 = vsub.f32 %v339_v38, %v348_v39 }
 0x2cf   : > { %v356_v41 = vsel %vm354_vm4, %v355_v40, 0.0 }
 0x2d0   : > { %358 = vst.msk [vmem:[%s235_s23] sm:$0xff] %vm357_vm5, %v356_v41 }
 0x2d1 PF: > { %p560_p9 = scmp.ge.s32.totalorder %s700_s18, 2  ;;  %s392_s19 = sand.u32 1, %s688_s15  }
 0x2d2   : > { %p897_p2 = scmp.ne.s32.totalorder %s890_s26, 0  ;;  %s393_s25 = scalar_lea.sflag [#allocation4], %s392_s19 }
 0x2d4   : > { %p555_p3 = pnand %p560_p9, %p897_p2 }
 0x2d6   : > { %683 = dma.done.wait (!%p555_p3), %s393_s25, 128  }
 0x2d7   : > { %685 = vsyncadd (!%p555_p3), %s393_s25, 4294967168  ;;  %p16_p4 = scmp.ge.s32.totalorder %s760_s21, 4   ;;  %s898_s15 = smov %s692_s16 }
 0x2d8   : > { %s899_s16 = smov %s696_s17  ;;  %s900_s17 = smov %s771_s24 }
 0x2d9   : > { %s901_s18 = smov %s760_s21  ;;  %18 = sbr.rel (!%p16_p4) target bundleno = 4 (0x4), region = 87 }
 0x2e0   :  { %405 = vsyncpa [#allocation3], 1 }
 0x2e1   :  { %407 = vsyncpa [#allocation3 + $0x1], 1 }
 0x2e2   :  { %408 = vsyncpa [#allocation4], 1 }
 0x2e3   :  { %410 = vsyncpa [#allocation4 + $0x1], 1 }

</bundles_post_ra>
